<compile_context>
chip_gen: v5e
topology: v5e:2x2
jax: 0.10.0
libtpu: 0.0.40
codegen_flags: <defaults>
</compile_context>

<pallas_src>
import functools

import jax
import jax.numpy as jnp
from jax import lax
from jax.experimental import pallas as pl
from jax.experimental.pallas import tpu as pltpu


def _pca_stats_kernel(x_ref, ss_ref, rs_ref, *, hw_total, t_hw):
    """Grid: (N 'parallel', HW-tiles 'arbitrary').

    x_ref : (C, t_hw)  native-layout slab for batch n, spatial tile j
    ss_ref: (C, C)     per-batch partial sum_squares (grid-resident over j)
    rs_ref: (C, 1)     per-batch partial running_sum (grid-resident over j)
    """
    j = pl.program_id(1)

    @pl.when(j == 0)
    def _init():
        ss_ref[...] = jnp.zeros_like(ss_ref)
        rs_ref[...] = jnp.zeros_like(rs_ref)

    xb = x_ref[...]  # (C, t_hw), native dtype (bf16 feeds the MXU directly)

    if hw_total % t_hw != 0:
        # cdiv grid: the last tile over-reads HBM; zero the invalid columns
        # (zeros do not perturb X^T@X or the column sums).
        col = lax.broadcasted_iota(jnp.int32, xb.shape, 1)
        xb = jnp.where(col < (hw_total - j * t_hw), xb, jnp.zeros_like(xb))

    # sum_squares partial: contract over the spatial (lane) axis -> (C, C).
    prec = lax.Precision.HIGHEST if xb.dtype == jnp.float32 else None
    ss_ref[...] += lax.dot_general(
        xb, xb, (((1,), (1,)), ((), ())),
        precision=prec, preferred_element_type=jnp.float32)
    # running_sum partial: per-channel spatial sum -> (C, 1).
    rs_ref[...] += jnp.sum(xb, axis=1, keepdims=True, dtype=jnp.float32)


def _choose_hw_tile(hw, c, itemsize):
    """Lane-dense HW tile sized to keep VMEM use well under v7x's 64 MiB."""
    # input double-buffer (2*c*t*itemsize) + double-buffered stat outputs.
    budget = 40 * 1024 * 1024 - 2 * (c * c + c) * 4
    max_t = max(budget // max(2 * c * itemsize, 1), 128)
    t = min(hw, 2048, int(max_t))
    if t < hw:
        t = max((t // 128) * 128, 128)  # partial tiles must be lane-aligned
    return t


def conv2d_pca_forward(x_nchw, *, t_hw=None, training=True):
    """Forward of Conv2DPCALayer.

    Returns (out, stats): out is the identity (x.clone() semantics); stats
    contains the training-mode buffer updates (None in eval mode).
    """
    N, C, H, W = x_nchw.shape
    HW = H * W
    out = x_nchw  # forward output is always the identity

    if not training:
        return out, None

    itemsize = jnp.dtype(x_nchw.dtype).itemsize
    if t_hw is None:
        t_hw = _choose_hw_tile(HW, C, itemsize)

    x3 = x_nchw.reshape(N, C, HW)  # free reshape: NCHW is already contiguous
    grid = (N, pl.cdiv(HW, t_hw))

    kernel = functools.partial(_pca_stats_kernel, hw_total=HW, t_hw=t_hw)

    ss_part, rs_part = pl.pallas_call(
        kernel,
        out_shape=(
            jax.ShapeDtypeStruct((N, C, C), jnp.float32),  # per-batch X^T X
            jax.ShapeDtypeStruct((N, C, 1), jnp.float32),  # per-batch col sums
        ),
        grid=grid,
        in_specs=[pl.BlockSpec((None, C, t_hw), lambda n, j: (n, 0, j))],
        out_specs=(
            pl.BlockSpec((None, C, C), lambda n, j: (n, 0, 0)),
            pl.BlockSpec((None, C, 1), lambda n, j: (n, 0, 0)),
        ),
        compiler_params=pltpu.CompilerParams(
            dimension_semantics=("parallel", "arbitrary"),
            vmem_limit_bytes=48 * 1024 * 1024,
        ),
        cost_estimate=pl.CostEstimate(
            flops=2 * N * HW * C * C + N * HW * C,
            transcendentals=0,
            bytes_accessed=N * C * HW * itemsize + N * (C * C + C) * 4,
        ),
    )(x3)

    stats = {
        "sum_squares_update": jnp.sum(ss_part, axis=0),          # (C, C)
        "running_sum_update": jnp.sum(rs_part, axis=0)[:, 0],    # (C,)
        "seen_samples_update": jnp.asarray(N * HW, jnp.float32),
    }
    return out, stats


def init_conv2d_pca_params(in_filters):
    """Deterministic parameter/buffer setup mirroring Conv2DPCALayer.__init__.

    None of these affect the forward output (the convs are dead code in the
    PyTorch forward), but they define the module's state.
    """
    mean = jnp.zeros((in_filters,), jnp.float32)
    transformation_matrix = jnp.eye(in_filters, dtype=jnp.float32)
    return {
        "eigenvalues": jnp.zeros((in_filters,), jnp.float32),
        "eigenvectors": jnp.zeros((in_filters, in_filters), jnp.float32),
        "sum_squares": jnp.zeros((in_filters, in_filters), jnp.float32),
        "running_sum": jnp.zeros((in_filters,), jnp.float32),
        "seen_samples": jnp.zeros((1,), jnp.float32),
        "mean": mean,
        "conv_weight": transformation_matrix[:, :, None, None],  # 1x1 conv
        "conv_bias": mean,
        "mean_conv_weight": jnp.zeros((in_filters, in_filters, 1, 1), jnp.float32),
        "mean_conv_bias": -mean,
    }


if __name__ == "__main__":
    key = jax.random.PRNGKey(0)
    N, C, H, W = 2, 4, 16, 16
    x = jax.random.normal(key, (N, C, H, W), dtype=jnp.float32)

    params = init_conv2d_pca_params(C)  # module state; unused in forward by design

    fwd = jax.jit(functools.partial(conv2d_pca_forward, training=True))
    out, stats = fwd(x)
    jax.block_until_ready((out, stats))

    # Reference check against plain JAX (same X as torch's permute/flatten).
    x2 = jnp.transpose(x, (0, 2, 3, 1)).reshape(-1, C)
    assert out.shape == x.shape and out.dtype == x.dtype
    assert jnp.allclose(out, x), "forward must be the identity (x.clone())"
    assert jnp.allclose(stats["sum_squares_update"], x2.T @ x2,
                        atol=1e-3, rtol=1e-4)
    assert jnp.allclose(stats["running_sum_update"], x2.sum(axis=0),
                        atol=1e-3, rtol=1e-4)
    assert int(stats["seen_samples_update"]) == N * H * W

    print("KERNEL_OK")
</pallas_src>

<mosaic_0001>
module attributes {stable_mosaic.version = 11 : i64} {
  func.func @_pca_stats_kernel(%arg0: i32, %arg1: i32, %arg2: memref<1x4x256xf32, #tpu.memory_space<vmem>>, %arg3: memref<1x4x4xf32, #tpu.memory_space<vmem>>, %arg4: memref<1x4x1xf32, #tpu.memory_space<vmem>>) attributes {dimension_semantics = [#tpu.dimension_semantics<parallel>, #tpu.dimension_semantics<arbitrary>], iteration_bounds = array<i64: 2, 1>, scalar_prefetch = 0 : i64, scratch_operands = 0 : i64, tpu.core_type = #tpu.core_type<tc>, window_params = [{transform_indices = @transform_0, window_bounds = array<i64: 1, 4, 256>}, {transform_indices = @transform_1, window_bounds = array<i64: 1, 4, 4>}, {transform_indices = @transform_2, window_bounds = array<i64: 1, 4, 1>}]} {
    %c0_i32 = arith.constant 0 : i32
    %0 = arith.cmpi eq, %arg1, %c0_i32 : i32
    %1 = arith.extui %0 : i1 to i32
    %c0_i32_0 = arith.constant 0 : i32
    %2 = arith.cmpi ne, %1, %c0_i32_0 : i32
    scf.if %2 {
      %cst_16 = arith.constant 0.000000e+00 : f32
      %20 = vector.broadcast %cst_16 : f32 to vector<4x4xf32>
      %c0_17 = arith.constant 0 : index
      %c0_18 = arith.constant 0 : index
      %c0_19 = arith.constant 0 : index
      %21 = vector.load %arg3[%c0_17, %c0_18, %c0_19] : memref<1x4x4xf32, #tpu.memory_space<vmem>>, vector<1x4x4xf32>
      %22 = vector.shape_cast %21 : vector<1x4x4xf32> to vector<4x4xf32>
      %23 = vector.shape_cast %20 : vector<4x4xf32> to vector<1x4x4xf32>
      tpu.vector_store %arg3[%c0_17, %c0_18, %c0_19], %23 {strides = array<i32>} : memref<1x4x4xf32, #tpu.memory_space<vmem>>, vector<1x4x4xf32>,
      %cst_20 = arith.constant 0.000000e+00 : f32
      %24 = vector.broadcast %cst_20 : f32 to vector<4x1xf32>
      %c0_21 = arith.constant 0 : index
      %c0_22 = arith.constant 0 : index
      %c0_23 = arith.constant 0 : index
      %25 = vector.load %arg4[%c0_21, %c0_22, %c0_23] : memref<1x4x1xf32, #tpu.memory_space<vmem>>, vector<1x4x1xf32>
      %26 = vector.shape_cast %25 : vector<1x4x1xf32> to vector<4x1xf32>
      %27 = vector.shape_cast %24 : vector<4x1xf32> to vector<1x4x1xf32>
      tpu.vector_store %arg4[%c0_21, %c0_22, %c0_23], %27 {strides = array<i32>} : memref<1x4x1xf32, #tpu.memory_space<vmem>>, vector<1x4x1xf32>,
    } else {
    }
    %c0 = arith.constant 0 : index
    %c0_1 = arith.constant 0 : index
    %c0_2 = arith.constant 0 : index
    %3 = vector.load %arg2[%c0, %c0_1, %c0_2] : memref<1x4x256xf32, #tpu.memory_space<vmem>>, vector<1x4x256xf32>
    %4 = vector.shape_cast %3 : vector<1x4x256xf32> to vector<4x256xf32>
    %c0_3 = arith.constant 0 : index
    %c0_4 = arith.constant 0 : index
    %c0_5 = arith.constant 0 : index
    %5 = vector.load %arg3[%c0_3, %c0_4, %c0_5] : memref<1x4x4xf32, #tpu.memory_space<vmem>>, vector<1x4x4xf32>
    %6 = vector.shape_cast %5 : vector<1x4x4xf32> to vector<4x4xf32>
    %cst = arith.constant dense<0.000000e+00> : vector<4x4xf32>
    %7 = tpu.matmul %4, %4, %cst {dimension_numbers = #tpu.dot_dimension_numbers<[1], [1], [0], [0], [0, 0, 1, 0], [], []>, precision = #tpu.contract_precision<fp32>} : vector<4x256xf32>, vector<4x256xf32>, vector<4x4xf32> -> vector<4x4xf32>
    %8 = arith.addf %6, %7 : vector<4x4xf32>
    %c0_6 = arith.constant 0 : index
    %c0_7 = arith.constant 0 : index
    %c0_8 = arith.constant 0 : index
    %9 = vector.load %arg3[%c0_6, %c0_7, %c0_8] : memref<1x4x4xf32, #tpu.memory_space<vmem>>, vector<1x4x4xf32>
    %10 = vector.shape_cast %9 : vector<1x4x4xf32> to vector<4x4xf32>
    %11 = vector.shape_cast %8 : vector<4x4xf32> to vector<1x4x4xf32>
    tpu.vector_store %arg3[%c0_6, %c0_7, %c0_8], %11 {strides = array<i32>} : memref<1x4x4xf32, #tpu.memory_space<vmem>>, vector<1x4x4xf32>,
    %c0_9 = arith.constant 0 : index
    %c0_10 = arith.constant 0 : index
    %c0_11 = arith.constant 0 : index
    %12 = vector.load %arg4[%c0_9, %c0_10, %c0_11] : memref<1x4x1xf32, #tpu.memory_space<vmem>>, vector<1x4x1xf32>
    %13 = vector.shape_cast %12 : vector<1x4x1xf32> to vector<4x1xf32>
    %cst_12 = arith.constant dense<0.000000e+00> : vector<4xf32>
    %14 = vector.multi_reduction <add>, %4, %cst_12 [1] : vector<4x256xf32> to vector<4xf32>
    %15 = vector.shape_cast %14 : vector<4xf32> to vector<4x1xf32>
    %16 = arith.addf %13, %15 : vector<4x1xf32>
    %c0_13 = arith.constant 0 : index
    %c0_14 = arith.constant 0 : index
    %c0_15 = arith.constant 0 : index
    %17 = vector.load %arg4[%c0_13, %c0_14, %c0_15] : memref<1x4x1xf32, #tpu.memory_space<vmem>>, vector<1x4x1xf32>
    %18 = vector.shape_cast %17 : vector<1x4x1xf32> to vector<4x1xf32>
    %19 = vector.shape_cast %16 : vector<4x1xf32> to vector<1x4x1xf32>
    tpu.vector_store %arg4[%c0_13, %c0_14, %c0_15], %19 {strides = array<i32>} : memref<1x4x1xf32, #tpu.memory_space<vmem>>, vector<1x4x1xf32>,
    return
  }
  func.func @transform_0(%arg0: i32, %arg1: i32) -> (i32, i32, i32) {
    %c0_i32 = arith.constant 0 : i32
    %c0_i32_0 = arith.constant 0 : i32
    return %arg0, %c0_i32, %arg1 : i32, i32, i32
  }
  func.func @transform_1(%arg0: i32, %arg1: i32) -> (i32, i32, i32) {
    %c0_i32 = arith.constant 0 : i32
    %c0_i32_0 = arith.constant 0 : i32
    %c0_i32_1 = arith.constant 0 : i32
    return %arg0, %c0_i32, %c0_i32_0 : i32, i32, i32
  }
  func.func @transform_2(%arg0: i32, %arg1: i32) -> (i32, i32, i32) {
    %c0_i32 = arith.constant 0 : i32
    %c0_i32_0 = arith.constant 0 : i32
    %c0_i32_1 = arith.constant 0 : i32
    return %arg0, %c0_i32, %c0_i32_0 : i32, i32, i32
  }
}

</mosaic_0001>

<bundles_post_ra>
// kernel: conv2d_pca_forward.1
= control target key start
LH: loop header
LB: loop body
LE: loop exit
PB: predicated region body
PF: predicated region fallthrough
CT: control target
= control target key end

     0   :  { %s687_s9 = smov 0   ;;  %s689_s10 = smov 0   ;;  %s734_s0 = inlined_call_operand.vmem [shape: f32[2,4,256], index: 0, kind: input, shape index: {}]   ;;  %s735_s1 = inlined_call_operand.vmem [shape: f32[2,4,4], index: 1, kind: output, shape index: {0}]   ;;  %s736_s2 = inlined_call_operand.vmem [shape: f32[2,4,1], index: 2, kind: output, shape index: {1}]  }
   0x1   :  { %s691_s11 = smov 0  }
   0x2 LB: > { %s25_s12 = sadd.s32 1, %s665_s10  ;;  %p614_p0 = scmp.ge.s32.totalorder %s669_s11, 1  ;;  %s669_s11 = sphi %s691_s11, %s13_s11   ;;  %s665_s10 = sphi %s689_s10, %s738_s10   ;;  %s661_s9 = sphi %s687_s9, %s737_s9  }
   0x3   : > { %p27_p1 = scmp.ge.s32.totalorder %s25_s12, 2  ;;  %p134_p2 = scmp.lt.s32.totalorder %s669_s11, 3 }
   0x5   : > { %s740_s12 = smov (%p27_p1, %s25_s12), 0  ;;  %p135_p3 = pnand %p614_p0, %p134_p2 }
   0x6   : > { %p164_p4 = scmp.lt.s32.totalorder (!%p135_p3), %s661_s9, 1 }
   0x7   : > { %138 = sbr.rel (%p135_p3) target bundleno = 196 (0xc4), region = 24 }
   0xc   : > { %s742_s9 = smov (!%p164_p4, %s661_s9), 1  ;;  %vm503_vm0 = vcmask 1043456   ;;  %vm185_vm1 = vcmask 27648   ;;  %vm187_vm2 = vcmask 3072   ;;  %v671_v30 = vmov 0.0  }
   0xd   : > { %s621_s13 = sshll.u32 %s742_s9, 3  ;;  %s617_s17 = sshll.u32 %s742_s9, 2 }
   0xe   : > { %s171_s16 = scalar_lea.vmem %s734_s0, %s621_s13  ;;  %s715_s20 = scalar_lea.vmem %s735_s1, %s617_s17 }
   0xf   : > { %v189_v0 = vld [vmem:[%s171_s16] sm:$0xff]  ;;  %s180_s23 = scalar_lea.vmem %s736_s2, %s617_s17  ;;  %186 = vst.msk [vmem:[%s715_s20] sm:$0xf] %vm185_vm1, %v671_v30 }
  0x10   : > { %192 = vst [vmem:[#allocation1] ss:$2 sm:$0xff] %v189_v0 }
  0x11   : > { %188 = vst.msk [vmem:[%s180_s23] sm:$0xf] %vm187_vm2, %v671_v30 }
  0x16   : > { %v190_v56 = vld [vmem:[%s715_s20] sm:$0xf] }
  0x17   : > { %v193_v1 = vld.sshfl [vmem:[#allocation1] sm:$0xff pattern:$0x75316420]  ;;  %v194_v2 = vld.sshfl [vmem:[#allocation1 + $0x8] sm:$0xff pattern:$0x75316420] }
  0x18   : > { %197 = vst [vmem:[#allocation1] ss:$2 sm:$0xff] %v189_v0  ;;  %v219_v3 = vand.u32 4294901760, %v193_v1  ;;  %v365_v5 = vand.u32 4294901760, %v194_v2  ;;  %v497_v32 = vld [vmem:[%s180_s23] sm:$0xf] }
  0x1a   : > { %v220_v4 = vsub.f32 %v193_v1, %v219_v3  ;;  %v366_v10 = vsub.f32 %v194_v2, %v365_v5 }
  0x1c   : > { %v221_v6 = vand.u32 4294901760, %v220_v4  ;;  %v367_v16 = vand.u32 4294901760, %v366_v10 }
  0x1e   : > { %v222_v7 = vsub.f32 %v220_v4, %v221_v6  ;;  %v368_v21 = vsub.f32 %v366_v10, %v367_v16 }
  0x1f   : > { %v198_v8 = vld.sshfl [vmem:[#allocation1] sm:$0xff pattern:$0x75316420]  ;;  %v199_v9 = vld.sshfl [vmem:[#allocation1 + $0x8] sm:$0xff pattern:$0x75316420] }
  0x20   : > { %v217_v11 = vand.u32 4294901760, %v198_v8  ;;  %v363_v12 = vand.u32 4294901760, %v199_v9  ;;  %498 = vst [vmem:[#allocation1] ss:$2 sm:$0xff] %v189_v0  ;;  %v223_v13 = vand.u32 4294901760, %v222_v7  ;;  %v369_v29 = vand.u32 4294901760, %v368_v21 }
  0x22   : > { %v244_v14 = vsub.f32 %v198_v8, %v217_v11  ;;  %218 = vmatpush.xpose.msra.mxu0 %v217_v11  ;;  %294 = vmatpush.xpose.msra.mxu3 %v217_v11  ;;  %v390_v15 = vsub.f32 %v199_v9, %v363_v12 }
  0x24   : > { %271 = vmatpush.xpose.msra.mxu2 %v244_v14  ;;  %v245_v17 = vand.u32 4294901760, %v244_v14  ;;  %v391_v18 = vand.u32 4294901760, %v390_v15 }
  0x25   : > { %224 = vmatmul.f32.vlgmr.msra.gmra.mxu0 %v223_v13  ;;  %298 = vmatmul.f32.vlgmr.msra.gmra.mxu3 %v221_v6 }
  0x26   : > { %v246_v19 = vsub.f32 %v244_v14, %v245_v17  ;;  %320 = vmatpush.xpose.msrb.mxu0 %v245_v17  ;;  %v392_v20 = vsub.f32 %v390_v15, %v391_v18 }
  0x27   : > { %274 = vmatmul.f32.vlgmr.msra.gmra.mxu2 %v220_v4  ;;  %v499_v22 = vld.sshfl [vmem:[#allocation1] sm:$0xff pattern:$0x75316420]  ;;  %v500_v23 = vld.sshfl [vmem:[#allocation1 + $0x8] sm:$0xff pattern:$0x75316420] }
  0x28   : > { %364 = vmatpush.xpose.msrb.mxu2 %v363_v12  ;;  %v247_v24 = vand.u32 4294901760, %v246_v19  ;;  %v393_v25 = vand.u32 4294901760, %v392_v20  ;;  %v504_v26 = vsel %vm503_vm0, %v499_v22, 0.0  ;;  %v505_v27 = vsel %vm503_vm0, %v500_v23, 0.0 }
  0x29   : > { %v506_v28 = vadd.f32 %v505_v27, %v504_v26 }
  0x2a   : > { %417 = vmatpush.xpose.msra.mxu0 %v390_v15  ;;  %248 = vmatpush.xpose.msra.mxu1 %v247_v24 }
  0x2b   : > { %394 = vmatpush.xpose.msrb.mxu3 %v393_v25  ;;  %507 = vadd.xlane.f32.xlu0 %v506_v28 }
  0x2c   : > { %466 = vmatpush.xpose.msra.mxu2 %v391_v18 }
  0x2d   : > { %250 = vmatmul.f32.vlgmr.msra.gmra.mxu1 %v219_v3  ;;  %322 = vmatmul.f32.vlgmr.msrb.gmra.mxu0 %v219_v3 }
  0x2e   : > { %342 = vmatpush.xpose.msrb.mxu1 %v217_v11  ;;  %396 = vmatmul.f32.vlgmr.msrb.gmra.mxu3 %v365_v5 }
  0x2f   : > { %488 = vmatpush.xpose.msra.mxu3 %v363_v12  ;;  %370 = vmatmul.f32.vlgmr.msrb.gmra.mxu2 %v369_v29 }
  0x32   : > { %440 = vmatpush.xpose.msra.mxu1 %v363_v12 }
  0x35   : > { %344 = vmatmul.f32.vlgmr.msrb.gmra.mxu1 %v219_v3  ;;  %420 = vmatmul.f32.vlgmr.msra.gmra.mxu0 %v366_v10 }
  0x36   : > { %490 = vmatmul.f32.vlgmr.msra.gmra.mxu3 %v365_v5 }
  0x37   : > { %468 = vmatmul.f32.vlgmr.msra.gmra.mxu2 %v365_v5 }
  0x3d   : > { %444 = vmatmul.f32.vlgmr.msra.gmra.mxu1 %v367_v16 }
  0x9e   : > { %v508_v31 = vpop.xlane.xlu0 %507 }
  0x9f   : > { %v509_v34 = vadd.f32 %v508_v31, %v497_v32 }
  0xa1   : > { %511 = vst.msk [vmem:[%s180_s23] sm:$0xf] %vm187_vm2, %v509_v34 }
  0xa2   : > { %v225_v33 = vpop.f32.mrf.mxu0 }
  0xa8   : > { %v299_v35 = vpop.f32.mrf.mxu3 }
  0xaa   : > { %v251_v36 = vpop.f32.mrf.mxu1  ;;  %v275_v37 = vpop.f32.mrf.mxu2 }
  0xab   : > { %v252_v38 = vadd.f32 %v251_v36, %v225_v33  ;;  %v323_v39 = vpop.f32.mrf.mxu0 }
  0xad   : > { %v276_v40 = vadd.f32 %v275_v37, %v252_v38 }
  0xaf   : > { %v300_v41 = vadd.f32 %v299_v35, %v276_v40 }
  0xb1   : > { %v324_v42 = vadd.f32 %v323_v39, %v300_v41  ;;  %v397_v43 = vpop.f32.mrf.mxu3 }
  0xb2   : > { %v345_v44 = vpop.f32.mrf.mxu1  ;;  %v371_v45 = vpop.f32.mrf.mxu2 }
  0xb3   : > { %v346_v46 = vadd.f32 %v345_v44, %v324_v42  ;;  %v421_v48 = vpop.f32.mrf.mxu0 }
  0xb5   : > { %v372_v47 = vadd.f32 %v371_v45, %v346_v46 }
  0xb7   : > { %v398_v49 = vadd.f32 %v397_v43, %v372_v47 }
  0xb9   : > { %v422_v50 = vadd.f32 %v421_v48, %v398_v49  ;;  %v491_v54 = vpop.f32.mrf.mxu3 }
  0xba   : > { %v445_v51 = vpop.f32.mrf.mxu1  ;;  %v469_v52 = vpop.f32.mrf.mxu2 }
  0xbb   : > { %v446_v53 = vadd.f32 %v445_v51, %v422_v50 }
  0xbd   : > { %v470_v55 = vadd.f32 %v469_v52, %v446_v53 }
  0xbf   : > { %v492_v57 = vadd.f32 %v491_v54, %v470_v55 }
  0xc1   : > { %v494_v58 = vadd.f32 %v492_v57, %v190_v56 }
  0xc3   : > { %496 = vst.msk [vmem:[%s715_s20] sm:$0xf] %vm185_vm1, %v494_v58 }
  0xc4 PF: > { %s13_s11 = sadd.s32 1, %s669_s11   ;;  %s737_s9 = smov %s665_s10 }
  0xc5   : > { %p10_p5 = scmp.ge.s32.totalorder %s13_s11, 4   ;;  %s738_s10 = smov %s740_s12 }
  0xc7   :  { %12 = sbr.rel (!%p10_p5) target bundleno = 2 (0x2), region = 70 }

</bundles_post_ra>
